<compile_context>
chip_gen: v7x
topology: tpu7x:2x2x1
jax: 0.10.0
libtpu: 0.0.40
codegen_flags: <defaults>
</compile_context>

<pallas_src>
import jax
import jax.numpy as jnp
from jax.experimental import pallas as pl
from jax.experimental.pallas import tpu as pltpu

LANE = 128


def _round_up(v, m):
    return ((v + m - 1) // m) * m


def _make_kernel(tk, n_valid_nodes, n_classes, inv_n):
    """Kernel closure over static tile size / real (unpadded) dims."""

    def kernel(a_ref, x_ref, w1_ref, b1_ref, w2_ref, b2_ref, wf_ref, bf_ref,
               out_ref, acc_ax_ref, acc_ah_ref, h1_ref):
        p = pl.program_id(1)           # 0: conv1 aggregation, 1: conv2 + head
        k = pl.program_id(2)           # contraction tile over the node axis
        nk = pl.num_programs(2)

        a_tile = a_ref[0]              # (N_pad, tk) bf16 column slab of A_hat

        # -------- phase 0: H1 = ReLU((A @ X) @ W1 + b1) --------------------
        @pl.when(p == 0)
        def _phase0():
            @pl.when(k == 0)
            def _():
                acc_ax_ref[...] = jnp.zeros_like(acc_ax_ref)

            # (A @ X) first: contraction width Fin << H.
            acc_ax_ref[...] += jnp.dot(a_tile, x_ref[0],
                                       preferred_element_type=jnp.float32)

            @pl.when(k == nk - 1)
            def _():
                h1 = jnp.dot(acc_ax_ref[...], w1_ref[...],
                             preferred_element_type=jnp.float32) + b1_ref[...]
                # dropout(p=0.5) is the identity at inference time
                h1_ref[...] = jnp.maximum(h1, 0.0).astype(h1_ref.dtype)

        # -------- phase 1: conv2 + mean pool + fc + log_softmax ------------
        @pl.when(p == 1)
        def _phase1():
            @pl.when(k == 0)
            def _():
                acc_ah_ref[...] = jnp.zeros_like(acc_ah_ref)

            start = pl.multiple_of(k * tk, tk)
            acc_ah_ref[...] += jnp.dot(a_tile, h1_ref[pl.ds(start, tk), :],
                                       preferred_element_type=jnp.float32)

            @pl.when(k == nk - 1)
            def _():
                h2 = jnp.dot(acc_ah_ref[...], w2_ref[...],
                             preferred_element_type=jnp.float32) + b2_ref[...]
                h2 = jnp.maximum(h2, 0.0)

                # global_mean_pool over the real (unpadded) nodes only.
                row = jax.lax.broadcasted_iota(jnp.int32, h2.shape, 0)
                h2 = jnp.where(row < n_valid_nodes, h2, 0.0)
                pooled = jnp.sum(h2, axis=0, keepdims=True) * inv_n  # (1, Hp)

                logits = jnp.dot(pooled, wf_ref[...],
                                 preferred_element_type=jnp.float32) + bf_ref[...]

                # log_softmax over the real classes (padded lanes masked out).
                col = jax.lax.broadcasted_iota(jnp.int32, logits.shape, 1)
                logits = jnp.where(col < n_classes, logits, -1e30)
                m = jnp.max(logits, axis=1, keepdims=True)
                z = logits - m
                lse = jnp.log(jnp.sum(jnp.exp(z), axis=1, keepdims=True))
                out_ref[0] = z - lse

    return kernel


def gcn_normalized_adjacency(edge_index, num_nodes):
    """Dense D^-1/2 (A + I) D^-1/2 matching torch_geometric's gcn_norm.

    Duplicate edges are summed (PyG scatter-add); self loops are only added
    for nodes that do not already have one (add_remaining_self_loops), so a
    pre-existing self loop keeps weight 1 instead of becoming 2.
    """
    src, dst = edge_index[0], edge_index[1]
    adj = jnp.zeros((num_nodes, num_nodes), jnp.float32)
    adj = adj.at[dst, src].add(1.0)                 # row = target, col = source
    diag = jnp.diagonal(adj)
    idx = jnp.arange(num_nodes)
    adj = adj.at[idx, idx].set(jnp.where(diag > 0, diag, 1.0))
    deg = jnp.sum(adj, axis=1)
    dinv = jnp.where(deg > 0, 1.0 / jnp.sqrt(deg), 0.0)
    return dinv[:, None] * adj * dinv[None, :]


def squat_gnn_forward_batched(x, edge_index, params, *, tk_pref=512,
                              interpret=False):
    """x: [B, N, Fin] f32, edge_index: [B, 2, E] i32  ->  [B, output_dim] f32."""
    w1, b1, w2, b2, wf, bf = params
    bsz, n, fin = x.shape
    hid = w1.shape[1]
    out_dim = wf.shape[1]

    # ---- padded, lane-dense shapes -----------------------------------------
    fp = _round_up(fin, LANE)
    hp = _round_up(hid, LANE)
    cp = _round_up(out_dim, LANE)
    n_pad = _round_up(max(n, 1), LANE)
    tk = tk_pref if n_pad >= tk_pref else n_pad
    n_pad = _round_up(n_pad, tk)
    kt = n_pad // tk

    # ---- dense normalized adjacency per graph, cast to bf16 ----------------
    # TODO(synk): for large sparse graphs, skip zero A-blocks via scalar
    # prefetch (block-sparse index_map) instead of a dense O(N^2) A_hat.
    a_hat = jax.vmap(lambda ei: gcn_normalized_adjacency(ei, n))(edge_index)
    a_pad = jnp.zeros((bsz, n_pad, n_pad), jnp.bfloat16)
    a_pad = a_pad.at[:, :n, :n].set(a_hat.astype(jnp.bfloat16))

    x_pad = jnp.zeros((bsz, n_pad, fp), jnp.bfloat16)
    x_pad = x_pad.at[:, :n, :fin].set(x.astype(jnp.bfloat16))

    def pad2(w, r, c):
        w = jnp.asarray(w, jnp.float32).reshape(-1, w.shape[-1]) \
            if w.ndim == 2 else jnp.asarray(w, jnp.float32).reshape(1, -1)
        o = jnp.zeros((r, c), jnp.float32)
        return o.at[:w.shape[0], :w.shape[1]].set(w)

    w1p = pad2(w1, fp, hp)
    b1p = pad2(b1, 1, hp)
    w2p = pad2(w2, hp, hp)
    b2p = pad2(b2, 1, hp)
    wfp = pad2(wf, hp, cp)
    bfp = pad2(bf, 1, cp)

    kernel = _make_kernel(tk, n, out_dim, 1.0 / float(n))

    grid_spec = pltpu.PrefetchScalarGridSpec(
        num_scalar_prefetch=0,
        grid=(bsz, 2, kt),
        in_specs=[
            # A_hat: stream column slabs (contraction tiles) of each graph.
            pl.BlockSpec((1, n_pad, tk), lambda b, p, k: (b, 0, k)),
            # X: matching row slab.
            pl.BlockSpec((1, tk, fp), lambda b, p, k: (b, k, 0)),
            # Weights / biases: whole-array, VMEM resident (constant index map).
            pl.BlockSpec((fp, hp), lambda b, p, k: (0, 0)),
            pl.BlockSpec((1, hp), lambda b, p, k: (0, 0)),
            pl.BlockSpec((hp, hp), lambda b, p, k: (0, 0)),
            pl.BlockSpec((1, hp), lambda b, p, k: (0, 0)),
            pl.BlockSpec((hp, cp), lambda b, p, k: (0, 0)),
            pl.BlockSpec((1, cp), lambda b, p, k: (0, 0)),
        ],
        out_specs=pl.BlockSpec((1, 1, cp), lambda b, p, k: (b, 0, 0)),
        scratch_shapes=[
            pltpu.VMEM((n_pad, fp), jnp.float32),    # accumulator for A @ X
            pltpu.VMEM((n_pad, hp), jnp.float32),    # accumulator for A @ H1
            pltpu.VMEM((n_pad, hp), jnp.bfloat16),   # conv1 activations (resident)
        ],
    )

    out = pl.pallas_call(
        kernel,
        out_shape=jax.ShapeDtypeStruct((bsz, 1, cp), jnp.float32),
        grid_spec=grid_spec,
        compiler_params=pltpu.CompilerParams(
            dimension_semantics=("parallel", "arbitrary", "arbitrary"),
            vmem_limit_bytes=48 * 1024 * 1024,   # headroom under v7x's 64 MiB
        ),
        interpret=interpret,
    )(a_pad, x_pad, w1p, b1p, w2p, b2p, wfp, bfp)

    return out[:, 0, :out_dim]


def squat_gnn_forward(x, edge_index, params):
    """Single-graph forward (batch=None), matches the PyTorch module signature."""
    return squat_gnn_forward_batched(x[None], edge_index[None], params)


def _reference_forward(x, edge_index, params):
    """Pure-JAX f32 reference for correctness checking."""
    w1, b1, w2, b2, wf, bf = params
    a = gcn_normalized_adjacency(edge_index, x.shape[0])
    h = jnp.maximum(a @ (x @ w1) + b1, 0.0)
    h = jnp.maximum(a @ (h @ w2) + b2, 0.0)
    pooled = jnp.mean(h, axis=0, keepdims=True)
    logits = pooled @ wf + bf
    return jax.nn.log_softmax(logits, axis=1)


def init_params(key, input_dim, hidden_dim, output_dim):
    k1, k2, k3 = jax.random.split(key, 3)
    w1 = jax.random.normal(k1, (input_dim, hidden_dim), jnp.float32) / jnp.sqrt(input_dim)
    b1 = jnp.zeros((1, hidden_dim), jnp.float32)
    w2 = jax.random.normal(k2, (hidden_dim, hidden_dim), jnp.float32) / jnp.sqrt(hidden_dim)
    b2 = jnp.zeros((1, hidden_dim), jnp.float32)
    wf = jax.random.normal(k3, (hidden_dim, output_dim), jnp.float32) / jnp.sqrt(hidden_dim)
    bf = jnp.zeros((1, output_dim), jnp.float32)
    return (w1, b1, w2, b2, wf, bf)


if __name__ == "__main__":
    INPUT_DIM, HIDDEN_DIM, OUTPUT_DIM = 4, 32, 2
    N_NODES, N_GRAPHS = 8, 2

    key = jax.random.PRNGKey(0)
    kx, kp = jax.random.split(key)

    # Batch of graphs: node features [B, N, Fin]
    x = jax.random.normal(kx, (N_GRAPHS, N_NODES, INPUT_DIM), jnp.float32)

    # Bidirectional ring connectivity, identical for both graphs: [B, 2, 2N]
    src = jnp.arange(N_NODES, dtype=jnp.int32)
    dst = (src + 1) % N_NODES
    ei = jnp.stack([jnp.concatenate([src, dst]),
                    jnp.concatenate([dst, src])], axis=0)
    edge_index = jnp.stack([ei, ei], axis=0)

    params = init_params(kp, INPUT_DIM, HIDDEN_DIM, OUTPUT_DIM)

    # Batched forward through the Pallas kernel.
    out = squat_gnn_forward_batched(x, edge_index, params)
    out = jax.block_until_ready(out)
    assert out.shape == (N_GRAPHS, OUTPUT_DIM)
    # log_softmax rows sum to 1 in probability space
    assert jnp.allclose(jnp.sum(jnp.exp(out), axis=1), 1.0, atol=1e-4)

    # Compare against pure-JAX f32 reference (bf16 A/X -> loose tolerance).
    ref = jnp.stack([_reference_forward(x[i], edge_index[i], params)[0]
                     for i in range(N_GRAPHS)])
    assert jnp.max(jnp.abs(out - ref)) < 0.1, (out, ref)

    # Single-graph path (batch=None semantics of the PyTorch forward).
    out1 = jax.block_until_ready(squat_gnn_forward(x[0], edge_index[0], params))
    assert out1.shape == (1, OUTPUT_DIM)

    print("KERNEL_OK")
</pallas_src>

<mosaic_0001>
module attributes {stable_mosaic.version = 11 : i64} {
  func.func @kernel(%arg0: i32, %arg1: i32, %arg2: i32, %arg3: memref<1x128x128xbf16, #tpu.memory_space<vmem>>, %arg4: memref<1x128x128xbf16, #tpu.memory_space<vmem>>, %arg5: memref<128x128xf32, #tpu.memory_space<vmem>>, %arg6: memref<1x128xf32, #tpu.memory_space<vmem>>, %arg7: memref<128x128xf32, #tpu.memory_space<vmem>>, %arg8: memref<1x128xf32, #tpu.memory_space<vmem>>, %arg9: memref<128x128xf32, #tpu.memory_space<vmem>>, %arg10: memref<1x128xf32, #tpu.memory_space<vmem>>, %arg11: memref<1x1x128xf32, #tpu.memory_space<vmem>>, %arg12: memref<128x128xf32, #tpu.memory_space<vmem>>, %arg13: memref<128x128xf32, #tpu.memory_space<vmem>>, %arg14: memref<128x128xbf16, #tpu.memory_space<vmem>>) attributes {dimension_semantics = [#tpu.dimension_semantics<parallel>, #tpu.dimension_semantics<arbitrary>, #tpu.dimension_semantics<arbitrary>], iteration_bounds = array<i64: 2, 2, 1>, scalar_prefetch = 0 : i64, scratch_operands = 3 : i64, tpu.core_type = #tpu.core_type<tc>, window_params = [{transform_indices = @transform_0, window_bounds = array<i64: 1, 128, 128>}, {transform_indices = @transform_1, window_bounds = array<i64: 1, 128, 128>}, {pipeline_mode = #tpu.pipeline_mode<synchronous>, transform_indices = @transform_2, window_bounds = array<i64: 128, 128>}, {pipeline_mode = #tpu.pipeline_mode<synchronous>, transform_indices = @transform_3, window_bounds = array<i64: 1, 128>}, {pipeline_mode = #tpu.pipeline_mode<synchronous>, transform_indices = @transform_4, window_bounds = array<i64: 128, 128>}, {pipeline_mode = #tpu.pipeline_mode<synchronous>, transform_indices = @transform_5, window_bounds = array<i64: 1, 128>}, {pipeline_mode = #tpu.pipeline_mode<synchronous>, transform_indices = @transform_6, window_bounds = array<i64: 128, 128>}, {pipeline_mode = #tpu.pipeline_mode<synchronous>, transform_indices = @transform_7, window_bounds = array<i64: 1, 128>}, {transform_indices = @transform_8, window_bounds = array<i64: 1, 1, 128>}]} {
    %c0 = arith.constant 0 : index
    %c0_0 = arith.constant 0 : index
    %c0_1 = arith.constant 0 : index
    %0 = vector.load %arg3[%c0, %c0_0, %c0_1] : memref<1x128x128xbf16, #tpu.memory_space<vmem>>, vector<1x128x128xbf16>
    %1 = vector.shape_cast %0 : vector<1x128x128xbf16> to vector<128x128xbf16>
    %c0_i32 = arith.constant 0 : i32
    %2 = arith.cmpi eq, %arg1, %c0_i32 : i32
    %3 = arith.extui %2 : i1 to i32
    %c0_i32_2 = arith.constant 0 : i32
    %4 = arith.cmpi ne, %3, %c0_i32_2 : i32
    scf.if %4 {
      %c0_i32_4 = arith.constant 0 : i32
      %8 = arith.cmpi eq, %arg2, %c0_i32_4 : i32
      %9 = arith.extui %8 : i1 to i32
      %c0_i32_5 = arith.constant 0 : i32
      %10 = arith.cmpi ne, %9, %c0_i32_5 : i32
      scf.if %10 {
        %cst_15 = arith.constant 0.000000e+00 : f32
        %20 = vector.broadcast %cst_15 : f32 to vector<128x128xf32>
        %c0_16 = arith.constant 0 : index
        %c0_17 = arith.constant 0 : index
        %21 = vector.load %arg12[%c0_16, %c0_17] : memref<128x128xf32, #tpu.memory_space<vmem>>, vector<128x128xf32>
        tpu.vector_store %arg12[%c0_16, %c0_17], %20 {strides = array<i32>} : memref<128x128xf32, #tpu.memory_space<vmem>>, vector<128x128xf32>,
      } else {
      }
      %c0_6 = arith.constant 0 : index
      %c0_7 = arith.constant 0 : index
      %11 = vector.load %arg12[%c0_6, %c0_7] : memref<128x128xf32, #tpu.memory_space<vmem>>, vector<128x128xf32>
      %c0_8 = arith.constant 0 : index
      %c0_9 = arith.constant 0 : index
      %c0_10 = arith.constant 0 : index
      %12 = vector.load %arg4[%c0_8, %c0_9, %c0_10] : memref<1x128x128xbf16, #tpu.memory_space<vmem>>, vector<1x128x128xbf16>
      %13 = vector.shape_cast %12 : vector<1x128x128xbf16> to vector<128x128xbf16>
      %cst = arith.constant dense<0.000000e+00> : vector<128x128xf32>
      %14 = tpu.matmul %1, %13, %cst {dimension_numbers = #tpu.dot_dimension_numbers<[1], [0], [0], [1], [0, 0, 1, 1], [], []>} : vector<128x128xbf16>, vector<128x128xbf16>, vector<128x128xf32> -> vector<128x128xf32>
      %15 = arith.addf %11, %14 : vector<128x128xf32>
      %c0_11 = arith.constant 0 : index
      %c0_12 = arith.constant 0 : index
      %16 = vector.load %arg12[%c0_11, %c0_12] : memref<128x128xf32, #tpu.memory_space<vmem>>, vector<128x128xf32>
      tpu.vector_store %arg12[%c0_11, %c0_12], %15 {strides = array<i32>} : memref<128x128xf32, #tpu.memory_space<vmem>>, vector<128x128xf32>,
      %c0_i32_13 = arith.constant 0 : i32
      %17 = arith.cmpi eq, %arg2, %c0_i32_13 : i32
      %18 = arith.extui %17 : i1 to i32
      %c0_i32_14 = arith.constant 0 : i32
      %19 = arith.cmpi ne, %18, %c0_i32_14 : i32
      scf.if %19 {
        %c0_15 = arith.constant 0 : index
        %c0_16 = arith.constant 0 : index
        %20 = vector.load %arg12[%c0_15, %c0_16] : memref<128x128xf32, #tpu.memory_space<vmem>>, vector<128x128xf32>
        %c0_17 = arith.constant 0 : index
        %c0_18 = arith.constant 0 : index
        %21 = vector.load %arg5[%c0_17, %c0_18] : memref<128x128xf32, #tpu.memory_space<vmem>>, vector<128x128xf32>
        %cst_19 = arith.constant dense<0.000000e+00> : vector<128x128xf32>
        %22 = tpu.matmul %20, %21, %cst_19 {dimension_numbers = #tpu.dot_dimension_numbers<[1], [0], [0], [1], [0, 0, 1, 1], [], []>} : vector<128x128xf32>, vector<128x128xf32>, vector<128x128xf32> -> vector<128x128xf32>
        %c0_20 = arith.constant 0 : index
        %c0_21 = arith.constant 0 : index
        %23 = vector.load %arg6[%c0_20, %c0_21] : memref<1x128xf32, #tpu.memory_space<vmem>>, vector<1x128xf32>
        %24 = vector.broadcast %23 : vector<1x128xf32> to vector<128x128xf32>
        %25 = arith.addf %22, %24 : vector<128x128xf32>
        %cst_22 = arith.constant 0.000000e+00 : f32
        %26 = vector.broadcast %cst_22 : f32 to vector<128x128xf32>
        %27 = arith.maximumf %25, %26 : vector<128x128xf32>
        %28 = arith.truncf %27 : vector<128x128xf32> to vector<128x128xbf16>
        %c0_23 = arith.constant 0 : index
        %c0_24 = arith.constant 0 : index
        %29 = vector.load %arg14[%c0_23, %c0_24] : memref<128x128xbf16, #tpu.memory_space<vmem>>, vector<128x128xbf16>
        tpu.vector_store %arg14[%c0_23, %c0_24], %28 {strides = array<i32>} : memref<128x128xbf16, #tpu.memory_space<vmem>>, vector<128x128xbf16>,
      } else {
      }
    } else {
    }
    %c1_i32 = arith.constant 1 : i32
    %5 = arith.cmpi eq, %arg1, %c1_i32 : i32
    %6 = arith.extui %5 : i1 to i32
    %c0_i32_3 = arith.constant 0 : i32
    %7 = arith.cmpi ne, %6, %c0_i32_3 : i32
    scf.if %7 {
      %c0_i32_4 = arith.constant 0 : i32
      %8 = arith.cmpi eq, %arg2, %c0_i32_4 : i32
      %9 = arith.extui %8 : i1 to i32
      %c0_i32_5 = arith.constant 0 : i32
      %10 = arith.cmpi ne, %9, %c0_i32_5 : i32
      scf.if %10 {
        %cst_13 = arith.constant 0.000000e+00 : f32
        %22 = vector.broadcast %cst_13 : f32 to vector<128x128xf32>
        %c0_14 = arith.constant 0 : index
        %c0_15 = arith.constant 0 : index
        %23 = vector.load %arg13[%c0_14, %c0_15] : memref<128x128xf32, #tpu.memory_space<vmem>>, vector<128x128xf32>
        tpu.vector_store %arg13[%c0_14, %c0_15], %22 {strides = array<i32>} : memref<128x128xf32, #tpu.memory_space<vmem>>, vector<128x128xf32>,
      } else {
      }
      %c128_i32 = arith.constant 128 : i32
      %11 = arith.muli %arg2, %c128_i32 : i32
      %12 = tpu.assume_multiple %11, 128 : i32
      %c0_6 = arith.constant 0 : index
      %c0_7 = arith.constant 0 : index
      %13 = vector.load %arg13[%c0_6, %c0_7] : memref<128x128xf32, #tpu.memory_space<vmem>>, vector<128x128xf32>
      %14 = arith.index_cast %12 : i32 to index
      %c0_8 = arith.constant 0 : index
      %15 = vector.load %arg14[%14, %c0_8] : memref<128x128xbf16, #tpu.memory_space<vmem>>, vector<128x128xbf16>
      %cst = arith.constant dense<0.000000e+00> : vector<128x128xf32>
      %16 = tpu.matmul %1, %15, %cst {dimension_numbers = #tpu.dot_dimension_numbers<[1], [0], [0], [1], [0, 0, 1, 1], [], []>} : vector<128x128xbf16>, vector<128x128xbf16>, vector<128x128xf32> -> vector<128x128xf32>
      %17 = arith.addf %13, %16 : vector<128x128xf32>
      %c0_9 = arith.constant 0 : index
      %c0_10 = arith.constant 0 : index
      %18 = vector.load %arg13[%c0_9, %c0_10] : memref<128x128xf32, #tpu.memory_space<vmem>>, vector<128x128xf32>
      tpu.vector_store %arg13[%c0_9, %c0_10], %17 {strides = array<i32>} : memref<128x128xf32, #tpu.memory_space<vmem>>, vector<128x128xf32>,
      %c0_i32_11 = arith.constant 0 : i32
      %19 = arith.cmpi eq, %arg2, %c0_i32_11 : i32
      %20 = arith.extui %19 : i1 to i32
      %c0_i32_12 = arith.constant 0 : i32
      %21 = arith.cmpi ne, %20, %c0_i32_12 : i32
      scf.if %21 {
        %c0_13 = arith.constant 0 : index
        %c0_14 = arith.constant 0 : index
        %22 = vector.load %arg13[%c0_13, %c0_14] : memref<128x128xf32, #tpu.memory_space<vmem>>, vector<128x128xf32>
        %c0_15 = arith.constant 0 : index
        %c0_16 = arith.constant 0 : index
        %23 = vector.load %arg7[%c0_15, %c0_16] : memref<128x128xf32, #tpu.memory_space<vmem>>, vector<128x128xf32>
        %cst_17 = arith.constant dense<0.000000e+00> : vector<128x128xf32>
        %24 = tpu.matmul %22, %23, %cst_17 {dimension_numbers = #tpu.dot_dimension_numbers<[1], [0], [0], [1], [0, 0, 1, 1], [], []>} : vector<128x128xf32>, vector<128x128xf32>, vector<128x128xf32> -> vector<128x128xf32>
        %c0_18 = arith.constant 0 : index
        %c0_19 = arith.constant 0 : index
        %25 = vector.load %arg8[%c0_18, %c0_19] : memref<1x128xf32, #tpu.memory_space<vmem>>, vector<1x128xf32>
        %26 = vector.broadcast %25 : vector<1x128xf32> to vector<128x128xf32>
        %27 = arith.addf %24, %26 : vector<128x128xf32>
        %cst_20 = arith.constant 0.000000e+00 : f32
        %28 = vector.broadcast %cst_20 : f32 to vector<128x128xf32>
        %29 = arith.maximumf %27, %28 : vector<128x128xf32>
        %30 = tpu.iota {dimensions = array<i32: 0>} : vector<128x128xi32>
        %c8_i32 = arith.constant 8 : i32
        %31 = vector.broadcast %c8_i32 : i32 to vector<128x128xi32>
        %32 = arith.cmpi slt, %30, %31 : vector<128x128xi32>
        %cst_21 = arith.constant 0.000000e+00 : f32
        %33 = vector.broadcast %cst_21 : f32 to vector<128x128xf32>
        %34 = arith.select %32, %29, %33 : vector<128x128xi1>, vector<128x128xf32>
        %cst_22 = arith.constant dense<0.000000e+00> : vector<128xf32>
        %35 = vector.multi_reduction <add>, %34, %cst_22 [0] : vector<128x128xf32> to vector<128xf32>
        %36 = vector.shape_cast %35 : vector<128xf32> to vector<1x128xf32>
        %cst_23 = arith.constant 1.250000e-01 : f32
        %37 = vector.broadcast %cst_23 : f32 to vector<1x128xf32>
        %38 = arith.mulf %36, %37 : vector<1x128xf32>
        %c0_24 = arith.constant 0 : index
        %c0_25 = arith.constant 0 : index
        %39 = vector.load %arg9[%c0_24, %c0_25] : memref<128x128xf32, #tpu.memory_space<vmem>>, vector<128x128xf32>
        %cst_26 = arith.constant dense<0.000000e+00> : vector<1x128xf32>
        %40 = tpu.matmul %38, %39, %cst_26 {dimension_numbers = #tpu.dot_dimension_numbers<[1], [0], [0], [1], [0, 0, 1, 1], [], []>} : vector<1x128xf32>, vector<128x128xf32>, vector<1x128xf32> -> vector<1x128xf32>
        %c0_27 = arith.constant 0 : index
        %c0_28 = arith.constant 0 : index
        %41 = vector.load %arg10[%c0_27, %c0_28] : memref<1x128xf32, #tpu.memory_space<vmem>>, vector<1x128xf32>
        %42 = arith.addf %40, %41 : vector<1x128xf32>
        %43 = tpu.iota {dimensions = array<i32: 1>} : vector<1x128xi32>
        %c2_i32 = arith.constant 2 : i32
        %44 = vector.broadcast %c2_i32 : i32 to vector<1x128xi32>
        %45 = arith.cmpi slt, %43, %44 : vector<1x128xi32>
        %cst_29 = arith.constant -1.000000e+30 : f32
        %46 = vector.broadcast %cst_29 : f32 to vector<1x128xf32>
        %47 = arith.select %45, %42, %46 : vector<1x128xi1>, vector<1x128xf32>
        %cst_30 = arith.constant dense<0xFF800000> : vector<1xf32>
        %48 = vector.multi_reduction <maximumf>, %47, %cst_30 [1] : vector<1x128xf32> to vector<1xf32>
        %49 = vector.shape_cast %48 : vector<1xf32> to vector<1x1xf32>
        %50 = vector.broadcast %49 : vector<1x1xf32> to vector<1x128xf32>
        %51 = arith.subf %47, %50 : vector<1x128xf32>
        %52 = math.exp %51 : vector<1x128xf32>
        %cst_31 = arith.constant dense<0.000000e+00> : vector<1xf32>
        %53 = vector.multi_reduction <add>, %52, %cst_31 [1] : vector<1x128xf32> to vector<1xf32>
        %54 = vector.shape_cast %53 : vector<1xf32> to vector<1x1xf32>
        %55 = math.log %54 : vector<1x1xf32>
        %56 = vector.broadcast %55 : vector<1x1xf32> to vector<1x128xf32>
        %57 = arith.subf %51, %56 : vector<1x128xf32>
        %c0_32 = arith.constant 0 : index
        %c0_33 = arith.constant 0 : index
        %c0_34 = arith.constant 0 : index
        %58 = vector.load %arg11[%c0_32, %c0_33, %c0_34] : memref<1x1x128xf32, #tpu.memory_space<vmem>>, vector<1x1x128xf32>
        %59 = vector.shape_cast %58 : vector<1x1x128xf32> to vector<1x128xf32>
        %60 = vector.shape_cast %57 : vector<1x128xf32> to vector<1x1x128xf32>
        tpu.vector_store %arg11[%c0_32, %c0_33, %c0_34], %60 {strides = array<i32>} : memref<1x1x128xf32, #tpu.memory_space<vmem>>, vector<1x1x128xf32>,
      } else {
      }
    } else {
    }
    return
  }
  func.func @transform_0(%arg0: i32, %arg1: i32, %arg2: i32) -> (i32, i32, i32) {
    %c0_i32 = arith.constant 0 : i32
    %c0_i32_0 = arith.constant 0 : i32
    return %arg0, %c0_i32, %arg2 : i32, i32, i32
  }
  func.func @transform_1(%arg0: i32, %arg1: i32, %arg2: i32) -> (i32, i32, i32) {
    %c0_i32 = arith.constant 0 : i32
    %c0_i32_0 = arith.constant 0 : i32
    return %arg0, %arg2, %c0_i32 : i32, i32, i32
  }
  func.func @transform_2(%arg0: i32, %arg1: i32, %arg2: i32) -> (i32, i32) {
    %c0_i32 = arith.constant 0 : i32
    %c0_i32_0 = arith.constant 0 : i32
    %c0_i32_1 = arith.constant 0 : i32
    return %c0_i32, %c0_i32_0 : i32, i32
  }
  func.func @transform_3(%arg0: i32, %arg1: i32, %arg2: i32) -> (i32, i32) {
    %c0_i32 = arith.constant 0 : i32
    %c0_i32_0 = arith.constant 0 : i32
    %c0_i32_1 = arith.constant 0 : i32
    return %c0_i32, %c0_i32_0 : i32, i32
  }
  func.func @transform_4(%arg0: i32, %arg1: i32, %arg2: i32) -> (i32, i32) {
    %c0_i32 = arith.constant 0 : i32
    %c0_i32_0 = arith.constant 0 : i32
    %c0_i32_1 = arith.constant 0 : i32
    return %c0_i32, %c0_i32_0 : i32, i32
  }
  func.func @transform_5(%arg0: i32, %arg1: i32, %arg2: i32) -> (i32, i32) {
    %c0_i32 = arith.constant 0 : i32
    %c0_i32_0 = arith.constant 0 : i32
    %c0_i32_1 = arith.constant 0 : i32
    return %c0_i32, %c0_i32_0 : i32, i32
  }
  func.func @transform_6(%arg0: i32, %arg1: i32, %arg2: i32) -> (i32, i32) {
    %c0_i32 = arith.constant 0 : i32
    %c0_i32_0 = arith.constant 0 : i32
    %c0_i32_1 = arith.constant 0 : i32
    return %c0_i32, %c0_i32_0 : i32, i32
  }
  func.func @transform_7(%arg0: i32, %arg1: i32, %arg2: i32) -> (i32, i32) {
    %c0_i32 = arith.constant 0 : i32
    %c0_i32_0 = arith.constant 0 : i32
    %c0_i32_1 = arith.constant 0 : i32
    return %c0_i32, %c0_i32_0 : i32, i32
  }
  func.func @transform_8(%arg0: i32, %arg1: i32, %arg2: i32) -> (i32, i32, i32) {
    %c0_i32 = arith.constant 0 : i32
    %c0_i32_0 = arith.constant 0 : i32
    %c0_i32_1 = arith.constant 0 : i32
    return %arg0, %c0_i32, %c0_i32_0 : i32, i32, i32
  }
}

</mosaic_0001>

<bundles_post_ra>
// kernel: tpu_custom_call.1
= control target key start
LH: loop header
LB: loop body
LE: loop exit
PB: predicated region body
PF: predicated region fallthrough
CT: control target
= control target key end

     0   :  { %s3059_s0 = inlined_call_operand.hbm [shape: bf16[2,128,128], index: 0, kind: input, shape index: {}]   ;;  %s3060_s1 = inlined_call_operand.hbm [shape: bf16[2,128,128], index: 1, kind: input, shape index: {}]   ;;  %s3061_s2 = inlined_call_operand.hbm [shape: f32[128,128], index: 2, kind: input, shape index: {}]   ;;  %s3062_s3 = inlined_call_operand.vmem [shape: f32[1,128], index: 3, kind: input, shape index: {}]   ;;  %s3063_s4 = inlined_call_operand.hbm [shape: f32[128,128], index: 4, kind: input, shape index: {}]   ;;  %s3064_s5 = inlined_call_operand.vmem [shape: f32[1,128], index: 5, kind: input, shape index: {}]   ;;  %s3065_s6 = inlined_call_operand.hbm [shape: f32[128,128], index: 6, kind: input, shape index: {}]   ;;  %s3066_s7 = inlined_call_operand.vmem [shape: f32[1,128], index: 7, kind: input, shape index: {}]   ;;  %s3067_s8 = inlined_call_operand.hbm [shape: f32[2,1,128], index: 8, kind: output, shape index: {}]  }
   0x1   :  { %3075 = sst [smem:[#allocation23_spill]] %s3059_s0 }
   0x2   :  { %3076 = sst [smem:[#allocation24_spill]] %s3061_s2 }
   0x3   :  { %3077 = sst [smem:[#allocation25_spill]] %s3063_s4 }
   0x4   :  { %3078 = sst [smem:[#allocation26_spill]] %s3064_s5 }
   0x5   :  { %3079 = sst [smem:[#allocation27_spill]] %s3065_s6 }
   0x6   :  { %3080 = sst [smem:[#allocation28_spill]] %s3066_s7 }
   0x7   :  { %3081 = sst [smem:[#allocation29_spill]] %s3067_s8 }
   0x8   :  { %13 = vsyncpa [#allocation6], 0 }
   0x9   :  { %15 = vsyncpa [#allocation6 + $0x1], 0 }
   0xa   :  { %16 = vsyncpa [#allocation9], 0 }
   0xb   :  { %18 = vsyncpa [#allocation9 + $0x1], 0 }
   0xc   :  { %19 = vsyncpa [#allocation12], 0 }
   0xd   :  { %20 = vsyncpa [#allocation7], 0 }
   0xe   :  { %22 = vsyncpa [#allocation7 + $0x1], 0  ;;  %s2621_s27 = smov 0   ;;  %s2623_s28 = smov 0  }
   0xf   :  { %s2625_s29 = smov 0   ;;  %s2627_s30 = smov 0  }
  0x10   :  { %s2629_s9 = smov 0   ;;  %s2631_s10 = smov 0  }
  0x11   :  { %s2633_s11 = smov 0   ;;  %s2635_s12 = smov 0  }
  0x12 LB: > { %3082 = sst [smem:[#allocation20_spill]] %s2533_s27  ;;  %s2662_s13 = sadd.s32 4294967295, %s2561_s12   ;;  %s2561_s12 = sphi %s2635_s12, %s28_s12   ;;  %s2557_s11 = sphi %s2633_s11, %s3118_s11   ;;  %s2553_s10 = sphi %s2631_s10, %s3117_s10   ;;  %s2549_s9 = sphi %s2629_s9, %s3116_s9   ;;  %s2545_s30 = sphi %s2627_s30, %s3115_s30   ;;  %s2541_s29 = sphi %s2625_s29, %s3114_s29   ;;  %s2537_s28 = sphi %s2623_s28, %s3113_s28   ;;  %s2533_s27 = sphi %s2621_s27, %s3112_s27  }
  0x13   : > { %3083 = sst [smem:[#allocation21_spill]] %s2549_s9  ;;  %s1711_s14 = sadd.s32 4294967294, %s2561_s12  }
  0x14   : > { %p69_p0 = scmp.ne.s32.totalorder %s2537_s28, %s2533_s27  ;;  %p3070_p1 = scmp.eq.s32.totalorder %s2662_s13, 0 }
  0x15   : > { %p253_p3 = scmp.eq.s32.totalorder %s1711_s14, 3  ;;  %p1712_p5 = scmp.ge.s32.totalorder %s2561_s12, 1 }
  0x16   : > { %p2671_p4 = por %p3070_p1, %p69_p0  ;;  %p260_p7 = scmp.lt.s32.totalorder %s2561_s12, 5 }
  0x17   : > { %p2676_p6 = por %p253_p3, %p69_p0  ;;  %s2563_s18 = smov [#allocation10]  }
  0x18   : > { %s3084_s15 = scalar_select %p2671_p4, 1, 0 }
  0x19   : > { %s3085_s16 = scalar_select %p2676_p6, 1, 0 }
  0x1a   : > { %p2681_p8 = pnand %p1712_p5, %p260_p7  ;;  %s272_s19 = sshll.u32 %s2563_s18, 4  ;;  %s2685_s19 = int_to_ptr.vmem [resolvable:$true] %s272_s19 }
  0x1b   : > { %3086 = sst [smem:[#allocation22_spill]] %s3085_s16  ;;  %s2564_s21 = smov [#allocation11]  }
  0x1c   : > { %s3087_s17 = scalar_select %p2681_p8, 1, 0 }
  0x1d   : > { %p2192_p9 = pneg %p2681_p8  ;;  %s288_s22 = sshll.u32 %s2564_s21, 4  ;;  %s2695_s22 = int_to_ptr.vmem [resolvable:$true] %s288_s22 }
  0x1e   : > { %s2565_s23 = smov [#allocation13]   ;;  %s3089_s2 = sld [smem:[#allocation24_spill]] }
  0x1f   : > { %p2691_p10 = pnand %p2192_p9, %p3070_p1  ;;  %s2697_s24 = sshll.u32 %s2565_s23, 4  ;;  %s305_s24 = int_to_ptr.vmem [resolvable:$true] %s2697_s24 }
  0x21   : > { %p2707_p12 = pneg %p2691_p10 }
  0x24   : > { %s2307_s14 = scalar_lea.hbm %s3089_s2, 2048 }
  0x25   : > { %p2308_p11 = scmp.ne.s32.totalorder %s3089_s2, %s2307_s14  ;;  %p2314_p3 = scmp.lt.u32.totalorder %s2307_s14, %s3089_s2 }
  0x27   : > { %p2310_p13 = pnand %p2707_p12, %p2308_p11 }
  0x29   : > { %p2311_p0 = pneg %p2310_p13 }
  0x2b   : > { %p2316_p5 = pnand %p2314_p3, %p2311_p0 }
  0x2d   : > { %2319 = shalt.err (!%p2316_p5)
}
  0x2e   : > { %s2320_s16 = scalar_lea.vmem %s2685_s19, 2048  ;;  %p2328_p2 = scmp.lt.s32.totalorder %s2685_s19, %s2685_s19 }
  0x2f   : > { %p2321_p7 = scmp.ne.s32.totalorder %s2685_s19, %s2320_s16  ;;  %p2329_p6 = scmp.lt.s32.totalorder %s2320_s16, %s2320_s16 }
  0x31   : > { %p2323_p9 = pnand %p2321_p7, %p2707_p12  ;;  %p2330_p11 = por %p2329_p6, %p2328_p2 }
  0x33   : > { %p2324_p1 = pneg %p2323_p9 }
  0x35   : > { %p2331_p13 = pnand %p2330_p11, %p2324_p1 }
  0x37   : > { %2334 = shalt.err (!%p2331_p13)
}
  0x38   : > { %s2566_s25 = smov 128   ;;  %s2567_s26 = smov 8  }
  0x39   : > { %2195 = dma.hbm_to_vmem [thread:$0]  (!%p2691_p10), %s3089_s2, 2048, %s2685_s19, [#allocation9], %s2566_s25, %s2566_s25, %s2567_s26  }
  0x3a   : > { %s3091_s4 = sld [smem:[#allocation25_spill]] }
  0x40   : > { %s2335_s16 = scalar_lea.hbm %s3091_s4, 2048 }
  0x41   : > { %p2336_p1 = scmp.ne.s32.totalorder %s3091_s4, %s2335_s16  ;;  %p2342_p0 = scmp.lt.u32.totalorder %s2335_s16, %s3091_s4 }
  0x43   : > { %p2338_p2 = pnand %p2336_p1, %p2707_p12 }
  0x45   : > { %p2339_p6 = pneg %p2338_p2 }
  0x47   : > { %p2344_p3 = pnand %p2342_p0, %p2339_p6 }
  0x49   : > { %2347 = shalt.err (!%p2344_p3)
}
  0x4a   : > { %s2348_s19 = scalar_lea.vmem %s2695_s22, 2048  ;;  %p2356_p11 = scmp.lt.s32.totalorder %s2695_s22, %s2695_s22 }
  0x4b   : > { %p2349_p5 = scmp.ne.s32.totalorder %s2695_s22, %s2348_s19  ;;  %p2357_p13 = scmp.lt.s32.totalorder %s2348_s19, %s2348_s19 }
  0x4d   : > { %p2351_p7 = pnand %p2349_p5, %p2707_p12  ;;  %p2358_p1 = por %p2357_p13, %p2356_p11 }
  0x4f   : > { %p2352_p9 = pneg %p2351_p7 }
  0x51   : > { %p2359_p2 = pnand %p2358_p1, %p2352_p9 }
  0x53   : > { %2362 = shalt.err (!%p2359_p2)
}
  0x54   : > { %2198 = dma.hbm_to_vmem [thread:$0]  (!%p2691_p10), %s3091_s4, 2048, %s2695_s22, [#allocation12], %s2566_s25, %s2566_s25, %s2567_s26  }
  0x55   : > { %s3092_s6 = sld [smem:[#allocation27_spill]] }
  0x5b   : > { %s2363_s14 = scalar_lea.hbm %s3092_s6, 2048 }
  0x5c   : > { %p2364_p6 = scmp.ne.s32.totalorder %s3092_s6, %s2363_s14  ;;  %p2370_p5 = scmp.lt.u32.totalorder %s2363_s14, %s3092_s6 }
  0x5e   : > { %p2366_p0 = pnand %p2364_p6, %p2707_p12 }
  0x60   : > { %p2367_p3 = pneg %p2366_p0 }
  0x62   : > { %p2372_p7 = pnand %p2370_p5, %p2367_p3 }
  0x64   : > { %2375 = shalt.err (!%p2372_p7)
}
  0x65   : > { %s2376_s19 = scalar_lea.vmem %s305_s24, 2048  ;;  %p2384_p1 = scmp.lt.s32.totalorder %s305_s24, %s305_s24 }
  0x66   : > { %p2377_p9 = scmp.ne.s32.totalorder %s305_s24, %s2376_s19  ;;  %p2385_p2 = scmp.lt.s32.totalorder %s2376_s19, %s2376_s19 }
  0x68   : > { %p2379_p11 = pnand %p2377_p9, %p2707_p12  ;;  %p2386_p4 = por %p2385_p2, %p2384_p1 }
  0x6a   : > { %p2380_p13 = pneg %p2379_p11 }
  0x6c   : > { %p2387_p8 = pnand %p2386_p4, %p2380_p13 }
  0x6e   : > { %2390 = shalt.err (!%p2387_p8)
}
  0x6f   : > { %2201 = dma.hbm_to_vmem [thread:$0]  (!%p2691_p10), %s3092_s6, 2048, %s305_s24, [#allocation12], %s2566_s25, %s2566_s25, %s2567_s26  }
  0x70   : > { %s43_s27 = sadd.s32 1, %s2553_s10  ;;  %s47_s20 = sadd.s32 1, %s2557_s11 }
  0x71   : > { %p45_p4 = scmp.ge.s32.totalorder %s43_s27, 2  ;;  %s56_s7 = sadd.s32 1, %s2541_s29 }
  0x72   : > { %p63_p8 = scmp.ne.s32.totalorder %s2541_s29, %s2537_s28  ;;  %p64_p12 = scmp.eq.s32.totalorder %s2561_s12, 0 }
  0x73   : > { %s3120_s27 = smov (%p45_p4, %s43_s27), 0  ;;  %s3122_s20 = smov (!%p45_p4, %s47_s20), %s2557_s11 }
  0x74   : > { %p3093_p6 = scmp.eq.s32.totalorder %s2662_s13, 3  ;;  %p49_p10 = scmp.ge.s32.totalorder %s3122_s20, 2 }
  0x75   : > { %p2216_p3 = scmp.lt.s32.totalorder %s2561_s12, 4  ;;  %p65_p5 = por %p64_p12, %p63_p8 }
  0x76   : > { %p2790_p0 = por %p3093_p6, %p63_p8  ;;  %s321_s24 = sand.u32 1, %s2541_s29  }
  0x77   : > { %s3124_s20 = smov (%p49_p10, %s3122_s20), 0  ;;  %s2798_s25 = sshll.u32 %s321_s24, 6 }
  0x78   : > { %s51_s26 = ssub.s32 %s2557_s11, %s3124_s20  ;;  %s3074_s9 = sshll.u32 %s2557_s11, 10 }
  0x79   : > { %p54_p7 = scmp.eq.s32.totalorder %s51_s26, 0  ;;  %s3095_s0 = sld [smem:[#allocation23_spill]] }
  0x7a   : > { %s325_s23 = scalar_lea.vmem [#allocation5], %s2798_s25  ;;  %p2818_p9 = pnand %p2216_p3, %p65_p5 }
  0x7b   : > { %s333_s16 = sshll.u32 %s325_s23, 4  ;;  %s2822_s5 = scalar_lea.sflag [#allocation6], %s321_s24  ;;  %s2814_s16 = int_to_ptr.vmem [resolvable:$true] %s333_s16 }
  0x7c   : > { %s2812_s19 = scalar_select %p54_p7, %s2541_s29, %s56_s7  }
  0x7d   : > { %p2393_p13 = pneg %p2818_p9 }
  0x7f   : > { %s2808_s21 = scalar_lea.hbm %s3095_s0, %s3074_s9  ;;  %s2396_s18 = scalar_lea.hbm %s3095_s0, 2048 }
  0x80   : > { %s2391_s26 = scalar_lea.hbm %s2808_s21, 1024  ;;  %p2397_p4 = scmp.lt.u32.totalorder %s2808_s21, %s3095_s0 }
  0x81   : > { %p2392_p11 = scmp.ne.s32.totalorder %s2808_s21, %s2391_s26  ;;  %p2398_p8 = scmp.lt.u32.totalorder %s2396_s18, %s2391_s26 }
  0x82   : > { %p2400_p6 = scmp.lt.u32.totalorder %s2391_s26, %s2808_s21 }
  0x83   : > { %p2394_p1 = pnand %p2393_p13, %p2392_p11  ;;  %p2399_p12 = por %p2398_p8, %p2397_p4 }
  0x85   : > { %p2395_p2 = pneg %p2394_p1  ;;  %p2401_p10 = por %p2400_p6, %p2399_p12 }
  0x87   : > { %p2402_p3 = pnand %p2401_p10, %p2395_p2 }
  0x89   : > { %2405 = shalt.err (!%p2402_p3)
}
  0x8a   : > { %s2406_s24 = scalar_lea.vmem %s2814_s16, 1024  ;;  %s2568_s7 = smov [#allocation5]  }
  0x8b   : > { %p2407_p5 = scmp.ne.s32.totalorder %s2814_s16, %s2406_s24  ;;  %s2411_s14 = sshll.u32 %s2568_s7, 4  ;;  %s2412_s14 = int_to_ptr.vmem [resolvable:$false] %s2411_s14 }
  0x8c   : > { %s2413_s9 = scalar_lea.vmem %s2412_s14, 2048  ;;  %p2414_p1 = scmp.lt.s32.totalorder %s2814_s16, %s2412_s14 }
  0x8d   : > { %p2409_p7 = pnand %p2407_p5, %p2393_p13  ;;  %p2415_p4 = scmp.lt.s32.totalorder %s2413_s9, %s2406_s24 }
  0x8f   : > { %p2410_p11 = pneg %p2409_p7  ;;  %p2416_p8 = por %p2415_p4, %p2414_p1 }
  0x91   : > { %p2417_p12 = pnand %p2416_p8, %p2410_p11 }
  0x93   : > { %2420 = shalt.err (!%p2417_p12)
}
  0x94   : > { %s2569_s26 = smov 64   ;;  %s2570_s18 = smov 4  }
  0x95   : > { %2205 = dma.hbm_to_vmem [thread:$0]  (!%p2818_p9), %s2808_s21, 1024, %s2814_s16, %s2822_s5, %s2569_s26, %s2569_s26, %s2570_s18  }
  0x96   : > { %s3097_s23 = sshll.u32 %s2557_s11, 10  ;;  %s347_s9 = scalar_lea.vmem [#allocation8], %s2798_s25 }
  0x97   : > { %s2858_s14 = scalar_lea.hbm %s3060_s1, %s3097_s23  ;;  %s356_s0 = sshll.u32 %s347_s9, 4  ;;  %s2861_s0 = int_to_ptr.vmem [resolvable:$true] %s356_s0 }
  0x98   : > { %s343_s2 = sand.u32 1, %s2561_s12   ;;  %s2421_s6 = scalar_lea.hbm %s2858_s14, 1024 }
  0x99   : > { %s2864_s4 = scalar_lea.sflag [#allocation9], %s343_s2  ;;  %p2422_p2 = scmp.ne.s32.totalorder %s2858_s14, %s2421_s6 }
  0x9a   : > { %s2426_s5 = scalar_lea.hbm %s3060_s1, 2048  ;;  %p2427_p3 = scmp.lt.u32.totalorder %s2858_s14, %s3060_s1 }
  0x9b   : > { %p2424_p6 = pnand %p2422_p2, %p2393_p13  ;;  %p2428_p5 = scmp.lt.u32.totalorder %s2426_s5, %s2421_s6 }
  0x9c   : > { %p2430_p11 = scmp.lt.u32.totalorder %s2421_s6, %s2858_s14 }
  0x9d   : > { %p2425_p10 = pneg %p2424_p6  ;;  %p2429_p7 = por %p2428_p5, %p2427_p3 }
  0x9f   : > { %p2431_p1 = por %p2430_p11, %p2429_p7 }
  0xa1   : > { %p2432_p4 = pnand %p2431_p1, %p2425_p10 }
  0xa3   : > { %2435 = shalt.err (!%p2432_p4)
}
  0xa4   : > { %s2436_s2 = scalar_lea.vmem %s2861_s0, 1024  ;;  %s2571_s25 = smov [#allocation8]  }
  0xa5   : > { %p2437_p8 = scmp.ne.s32.totalorder %s2861_s0, %s2436_s2  ;;  %s2441_s7 = sshll.u32 %s2571_s25, 4  ;;  %s2442_s7 = int_to_ptr.vmem [resolvable:$false] %s2441_s7 }
  0xa6   : > { %s2443_s9 = scalar_lea.vmem %s2442_s7, 2048  ;;  %p2444_p6 = scmp.lt.s32.totalorder %s2861_s0, %s2442_s7 }
  0xa7   : > { %p2439_p12 = pnand %p2437_p8, %p2393_p13  ;;  %p2445_p3 = scmp.lt.s32.totalorder %s2443_s9, %s2436_s2 }
  0xa9   : > { %p2440_p2 = pneg %p2439_p12  ;;  %p2446_p5 = por %p2445_p3, %p2444_p6 }
  0xab   : > { %p2447_p7 = pnand %p2446_p5, %p2440_p2 }
  0xad   : > { %2450 = shalt.err (!%p2447_p7)
}
  0xae   : > { %2208 = dma.hbm_to_vmem [thread:$0]  (!%p2818_p9), %s2858_s14, 1024, %s2861_s0, %s2864_s4, %s2569_s26, %s2569_s26, %s2570_s18  }
  0xaf   : > { %p3098_p13 = scmp.ne.s32.totalorder %s3087_s17, 0 }
  0xb0   : > { %s2896_s6 = sand.u32 (!%p3098_p13), 1, %s2537_s28   ;;  %p3099_p10 = scmp.ne.s32.totalorder (!%p3098_p13), %s3084_s15, 0 }
  0xb1   : > { %368 = sbr.rel (%p3098_p13) target bundleno = 1733 (0x6c5), region = 52  ;;  %s1724_s21 = sshll.u32 (!%p3098_p13), %s2896_s6, 6 }
  0xb2   : > { %s371_s16 = scalar_lea.sflag (!%p3098_p13), [#allocation6], %s2896_s6  ;;  %s374_s5 = scalar_lea.vmem (!%p3098_p13), [#allocation5], %s1724_s21 }
  0xb8   : > { %2512 = dma.done.wait (%p3099_p10), %s371_s16, 1024  }
  0xb9   : > { %2514 = vsyncadd (%p3099_p10), %s371_s16, 4294966272  ;;  %s379_s0 = sand.u32 1, %s2662_s13   ;;  %s2905_s17 = scalar_lea.vmem [#allocation8], %s1724_s21 }
  0xba   : > { %s380_s4 = scalar_lea.sflag [#allocation9], %s379_s0 }
  0xbb   : > { %2516 = dma.done.wait (%p3099_p10), %s380_s4, 1024  }
  0xbc   : > { %2518 = vsyncadd (%p3099_p10), %s380_s4, 4294966272  ;;  %p3100_p9 = scmp.eq.s32.totalorder %s2662_s13, 0 }
  0xbe   : > { %2520 = dma.done.wait (%p3100_p9), [#allocation9], 2048   ;;  %p3101_p11 = pmov %p3100_p9 }
  0xbf   : > { %p3102_p1 = pmov %p3100_p9 }
  0xc0   : > { %2522 = vsyncadd (%p3101_p11), [#allocation9], 4294965248 }
  0xc1   : > { %2524 = dma.done.wait (%p3102_p1), [#allocation12], 4096   ;;  %p3103_p4 = pmov %p3102_p1 }
  0xc2   : > { %v2919_v0 = vld [vmem:[%s374_s5] sm:$0xf]  ;;  %v2921_v1 = vld [vmem:[%s374_s5 + $0x4] sm:$0xf]  ;;  %v2923_v2 = vld [vmem:[%s374_s5 + $0x8] sm:$0xf] }
  0xc3   : > { %2526 = vsyncadd (%p3103_p4), [#allocation12], 4294963200  ;;  %v2925_v3 = vld [vmem:[%s374_s5 + $0xc] sm:$0xf]  ;;  %v2927_v4 = vld [vmem:[%s374_s5 + $0x10] sm:$0xf] }
  0xc4   : > { %v2929_v5 = vld [vmem:[%s374_s5 + $0x14] sm:$0xf]  ;;  %v2931_v6 = vld [vmem:[%s374_s5 + $0x18] sm:$0xf]  ;;  %v2933_v7 = vld [vmem:[%s374_s5 + $0x1c] sm:$0xf] }
  0xc5   : > { %v2935_v8 = vld [vmem:[%s374_s5 + $0x20] sm:$0xf]  ;;  %v2937_v9 = vld [vmem:[%s374_s5 + $0x24] sm:$0xf]  ;;  %v2939_v10 = vld [vmem:[%s374_s5 + $0x28] sm:$0xf] }
  0xc6   : > { %v2941_v11 = vld [vmem:[%s374_s5 + $0x2c] sm:$0xf]  ;;  %v2943_v12 = vld [vmem:[%s374_s5 + $0x30] sm:$0xf]  ;;  %v2945_v13 = vld [vmem:[%s374_s5 + $0x34] sm:$0xf] }
  0xc7   : > { %v2947_v14 = vld [vmem:[%s374_s5 + $0x38] sm:$0xf]  ;;  %v2949_v15 = vld [vmem:[%s374_s5 + $0x3c] sm:$0xf]  ;;  %s431_s13 = scalar_lea.vmem [#allocation14], %s2896_s6  ;;  %p1729_p8 = scmp.ne.s32.totalorder %s2545_s30, 0 }
  0xc8   : > { %v2295_v16 = vld [vmem:[%s2905_s17] sm:$0xff] (!%p1729_p8)   ;;  %v1730_v17 = vcombine.low (!%p1729_p8), %v2919_v0, %v2921_v1  ;;  %v2296_v18 = vld [vmem:[%s2905_s17 + $0x8] sm:$0xff] (!%p1729_p8)   ;;  %v2297_v19 = vld [vmem:[%s2905_s17 + $0x10] sm:$0xff] (!%p1729_p8)   ;;  %v1731_v46 = vcombine.low (!%p1729_p8), %v2923_v2, %v2925_v3  ;;  %v1732_v47 = vcombine.low (!%p1729_p8), %v2927_v4, %v2929_v5  ;;  %v1733_v48 = vcombine.low (!%p1729_p8), %v2931_v6, %v2933_v7 }
  0xc9   : > { %453 = sbr.rel (%p1729_p8) target bundleno = 696 (0x2b8), region = 76  ;;  %1875 = vmatprep.subr.bf16.mxu0 (!%p1729_p8), %v2295_v16  ;;  %v2298_v20 = vld [vmem:[%s2905_s17 + $0x18] sm:$0xff] (!%p1729_p8)   ;;  %v750_v21 = vld [vmem:[#allocation10] sm:$0xff] (!%p1729_p8)  ;;  %v751_v22 = vld [vmem:[#allocation10 + $0x8] sm:$0xff] (!%p1729_p8)  ;;  %v1734_v49 = vcombine.low (!%p1729_p8), %v2935_v8, %v2937_v9  ;;  %v1735_v50 = vcombine.low (!%p1729_p8), %v2939_v10, %v2941_v11  ;;  %v1736_v51 = vcombine.low (!%p1729_p8), %v2943_v12, %v2945_v13  ;;  %v1737_v52 = vcombine.low (!%p1729_p8), %v2947_v14, %v2949_v15 }
  0xca   : > { %1891 = vmatprep.mubr.bf16.mxu0 (!%p1729_p8), %v1730_v17  ;;  %1876 = vmatpush3.bf16.msra.mxu0 (!%p1729_p8), %v2295_v16  ;;  %v752_v23 = vld [vmem:[#allocation10 + $0x10] sm:$0xff] (!%p1729_p8)  ;;  %v2086_v24 = vpack.c.bf16 (!%p1729_p8), %v751_v22, %v750_v21  ;;  %v753_v25 = vld [vmem:[#allocation10 + $0x18] sm:$0xff] (!%p1729_p8)  ;;  %v754_v27 = vld [vmem:[#allocation10 + $0x20] sm:$0xff] (!%p1729_p8) }
  0xcb   : > { %1877 = vmatprep.subr.bf16.mxu0 (!%p1729_p8), %v2296_v18  ;;  %v2090_v26 = vpack.c.bf16 (!%p1729_p8), %v753_v25, %v752_v23  ;;  %v755_v28 = vld [vmem:[#allocation10 + $0x28] sm:$0xff] (!%p1729_p8)  ;;  %v2299_v29 = vld [vmem:[%s2905_s17 + $0x20] sm:$0xff] (!%p1729_p8)   ;;  %v756_v31 = vld [vmem:[#allocation10 + $0x30] sm:$0xff] (!%p1729_p8) }
  0xcc   : > { %2087 = vmatprep.subr.bf16.mxu1 (!%p1729_p8), %v2086_v24  ;;  %v2094_v30 = vpack.c.bf16 (!%p1729_p8), %v755_v28, %v754_v27  ;;  %v757_v32 = vld [vmem:[#allocation10 + $0x38] sm:$0xff] (!%p1729_p8)  ;;  %v2300_v33 = vld [vmem:[%s2905_s17 + $0x28] sm:$0xff] (!%p1729_p8)   ;;  %v758_v35 = vld [vmem:[#allocation10 + $0x40] sm:$0xff] (!%p1729_p8) }
  0xcd   : > { %2089 = vmatpush3.bf16.msra.mxu1 (!%p1729_p8), %v2086_v24  ;;  %v2098_v34 = vpack.c.bf16 (!%p1729_p8), %v757_v32, %v756_v31  ;;  %v759_v36 = vld [vmem:[#allocation10 + $0x48] sm:$0xff] (!%p1729_p8)  ;;  %v2301_v37 = vld [vmem:[%s2905_s17 + $0x30] sm:$0xff] (!%p1729_p8)   ;;  %v761_v40 = vld [vmem:[#allocation10 + $0x58] sm:$0xff] (!%p1729_p8) }
  0xce   : > { %1878 = vmatpush3.bf16.msra.mxu0 (!%p1729_p8), %v2296_v18  ;;  %2091 = vmatprep.subr.bf16.mxu1 (!%p1729_p8), %v2090_v26  ;;  %v2102_v38 = vpack.c.bf16 (!%p1729_p8), %v759_v36, %v758_v35  ;;  %v760_v39 = vld [vmem:[#allocation10 + $0x50] sm:$0xff] (!%p1729_p8)  ;;  %v2302_v41 = vld [vmem:[%s2905_s17 + $0x38] sm:$0xff] (!%p1729_p8)   ;;  %v762_v43 = vld [vmem:[#allocation10 + $0x60] sm:$0xff] (!%p1729_p8) }
  0xcf   : > { %1879 = vmatprep.subr.bf16.mxu0 (!%p1729_p8), %v2297_v19  ;;  %v2106_v42 = vpack.c.bf16 (!%p1729_p8), %v761_v40, %v760_v39  ;;  %v763_v44 = vld [vmem:[#allocation10 + $0x68] sm:$0xff] (!%p1729_p8)  ;;  %v764_v53 = vld [vmem:[#allocation10 + $0x70] sm:$0xff] (!%p1729_p8)  ;;  %v765_v54 = vld [vmem:[#allocation10 + $0x78] sm:$0xff] (!%p1729_p8) }
  0xd0   : > { %v2110_v45 = vpack.c.bf16 %v763_v44, %v762_v43  ;;  %v2114_v55 = vpack.c.bf16 %v765_v54, %v764_v53  ;;  %v1746_v24 = vld [vmem:[%s3062_s3] ss:$0 sm:$0xff] }
  0xd1   : > { %2093 = vmatpush3.bf16.msra.mxu1 %v2090_v26 }
  0xd2   : > { %1880 = vmatpush3.bf16.msra.mxu0 %v2297_v19  ;;  %2095 = vmatprep.subr.bf16.mxu1 %v2094_v30 }
  0xd3   : > { %1881 = vmatprep.subr.bf16.mxu0 %v2298_v20 }
  0xd5   : > { %2097 = vmatpush3.bf16.msra.mxu1 %v2094_v30 }
  0xd6   : > { %1882 = vmatpush3.bf16.msra.mxu0 %v2298_v20  ;;  %2099 = vmatprep.subr.bf16.mxu1 %v2098_v34 }
  0xd7   : > { %1883 = vmatprep.subr.bf16.mxu0 %v2299_v29 }
  0xd9   : > { %2101 = vmatpush3.bf16.msra.mxu1 %v2098_v34 }
  0xda   : > { %1884 = vmatpush3.bf16.msra.mxu0 %v2299_v29  ;;  %2103 = vmatprep.subr.bf16.mxu1 %v2102_v38 }
  0xdb   : > { %1885 = vmatprep.subr.bf16.mxu0 %v2300_v33 }
  0xdd   : > { %2105 = vmatpush3.bf16.msra.mxu1 %v2102_v38 }
  0xde   : > { %1886 = vmatpush3.bf16.msra.mxu0 %v2300_v33  ;;  %2107 = vmatprep.subr.bf16.mxu1 %v2106_v42 }
  0xdf   : > { %1887 = vmatprep.subr.bf16.mxu0 %v2301_v37 }
  0xe1   : > { %2109 = vmatpush3.bf16.msra.mxu1 %v2106_v42 }
  0xe2   : > { %1888 = vmatpush3.bf16.msra.mxu0 %v2301_v37  ;;  %2111 = vmatprep.subr.bf16.mxu1 %v2110_v45 }
  0xe3   : > { %1889 = vmatprep.subr.bf16.mxu0 %v2302_v41 }
  0xe5   : > { %2113 = vmatpush3.bf16.msra.mxu1 %v2110_v45 }
  0xe6   : > { %1890 = vmatpush3.bf16.msra.mxu0 %v2302_v41  ;;  %2115 = vmatprep.subr.bf16.mxu1 %v2114_v55 }
  0xe9   : > { %1892 = vmatmul.mubr.bf16.vlgmr.msra.gmra.mrb[0].mxu0 %v1731_v46  ;;  %2117 = vmatpush3.bf16.msra.mxu1 %v2114_v55 }
  0xea   : > { %1895 = vmatprep.mubr.bf16.mxu0 %v1732_v47 }
  0xf1   : > { %1896 = vmatmul.mubr.bf16.gmra.mrb[4].mxu0 %v1733_v48 }
  0xf2   : > { %1899 = vmatprep.mubr.bf16.mxu0 %v1734_v49 }
  0xf9   : > { %1900 = vmatmul.mubr.bf16.gmra.mrb[8].mxu0 %v1735_v50 }
  0xfa   : > { %1903 = vmatprep.mubr.bf16.mxu0 %v1736_v51 }
 0x101   : > { %1904 = vmatmul.mubr.bf16.gmra.mrb[12].mxu0 %v1737_v52 }
 0x1bc   : > { %v1893_v56 = vpop.f32.mrb[0].mxu0 }
 0x1bd   : > { %v636_v57 = vpop.f32.mrb[1].mxu0 }
 0x1be   : > { %v1894_v58 = vpop.f32.mrb[2].mxu0  ;;  %1939 = vmatprep.mubr.f32.mxu1 %v636_v57 }
 0x1bf   : > { %v639_v59 = vpop.f32.mrb[3].mxu0 }
 0x1c0   : > { %1940 = vmatmul.mubr.f32.vlgmr.msra.gmra.mrb[0].mxu1 %v639_v59 }
 0x1c1   : > { %1942 = vmatprep.mubr.f32.mxu1 %v1893_v56 }
 0x1c4   : > { %v1897_v60 = vpop.f32.mrb[4].mxu0  ;;  %1943 = vmatmul.mubr.f32.gmra.mrb[2].mxu1 %v1894_v58 }
 0x1c5   : > { %v652_v61 = vpop.f32.mrb[5].mxu0 }
 0x1c6   : > { %v1898_v62 = vpop.f32.mrb[6].mxu0  ;;  %1945 = vmatprep.mubr.f32.mxu1 %v652_v61 }
 0x1c7   : > { %v655_v63 = vpop.f32.mrb[7].mxu0 }
 0x1c8   : > { %1946 = vmatmul.mubr.f32.gmra.mrb[4].mxu1 %v655_v63 }
 0x1c9   : > { %1948 = vmatprep.mubr.f32.mxu1 %v1897_v60 }
 0x1cc   : > { %v1901_v16 = vpop.f32.mrb[8].mxu0  ;;  %1949 = vmatmul.mubr.f32.gmra.mrb[6].mxu1 %v1898_v62 }
 0x1cd   : > { %v668_v17 = vpop.f32.mrb[9].mxu0 }
 0x1ce   : > { %v1902_v18 = vpop.f32.mrb[10].mxu0  ;;  %1951 = vmatprep.mubr.f32.mxu1 %v668_v17 }
 0x1cf   : > { %v671_v19 = vpop.f32.mrb[11].mxu0 }
 0x1d0   : > { %1952 = vmatmul.mubr.f32.gmra.mrb[8].mxu1 %v671_v19 }
 0x1d1   : > { %1954 = vmatprep.mubr.f32.mxu1 %v1901_v16 }
 0x1d4   : > { %v1905_v20 = vpop.f32.mrb[12].mxu0  ;;  %1955 = vmatmul.mubr.f32.gmra.mrb[10].mxu1 %v1902_v18 }
 0x1d5   : > { %v684_v21 = vpop.f32.mrb[13].mxu0 }
 0x1d6   : > { %v1906_v22 = vpop.f32.mrb[14].mxu0  ;;  %1957 = vmatprep.mubr.f32.mxu1 %v684_v21 }
 0x1d7   : > { %v687_v23 = vpop.f32.mrb[15].mxu0 }
 0x1d8   : > { %1958 = vmatmul.mubr.f32.gmra.mrb[12].mxu1 %v687_v23 }
 0x1d9   : > { %1960 = vmatprep.mubr.f32.mxu1 %v1905_v20 }
 0x1dc   : > { %1961 = vmatmul.mubr.f32.gmra.mrb[14].mxu1 %v1906_v22 }
 0x293   : > { %v1941_v25 = vpop.f32.mrb[0].mxu1 }
 0x294   : > { %v845_v26 = vadd.f32 %v1941_v25, %v1746_v24  ;;  %v839_v27 = vpop.f32.mrb[1].mxu1 }
 0x295   : > { %v840_v28 = vadd.f32 %v1746_v24, %v839_v27 }
 0x296   : > { %v919_v29 = vmax.f32 %v845_v26, 0.0 }
 0x297   : > { %v918_v30 = vmax.f32 %v840_v28, 0.0  ;;  %v1944_v31 = vpop.f32.mrb[2].mxu1 }
 0x298   : > { %v855_v32 = vadd.f32 %v1944_v31, %v1746_v24  ;;  %v849_v33 = vpop.f32.mrb[3].mxu1 }
 0x299   : > { %v934_v34 = vpack.c.bf16 %v919_v29, %v918_v30  ;;  %v850_v35 = vadd.f32 %v1746_v24, %v849_v33 }
 0x29a   : > { %v921_v36 = vmax.f32 %v855_v32, 0.0 }
 0x29b   : > { %942 = vst [vmem:[#allocation4] sm:$0xff] %v934_v34  ;;  %v920_v37 = vmax.f32 %v850_v35, 0.0  ;;  %v1947_v38 = vpop.f32.mrb[4].mxu1 }
 0x29c   : > { %v865_v39 = vadd.f32 %v1947_v38, %v1746_v24  ;;  %v859_v40 = vpop.f32.mrb[5].mxu1 }
 0x29d   : > { %v935_v41 = vpack.c.bf16 %v921_v36, %v920_v37  ;;  %v860_v42 = vadd.f32 %v1746_v24, %v859_v40 }
 0x29e   : > { %v923_v43 = vmax.f32 %v865_v39, 0.0 }
 0x29f   : > { %943 = vst [vmem:[#allocation4 + $0x8] sm:$0xff] %v935_v41  ;;  %v922_v44 = vmax.f32 %v860_v42, 0.0  ;;  %v1950_v45 = vpop.f32.mrb[6].mxu1 }
 0x2a0   : > { %v875_v46 = vadd.f32 %v1950_v45, %v1746_v24  ;;  %v869_v47 = vpop.f32.mrb[7].mxu1 }
 0x2a1   : > { %v936_v48 = vpack.c.bf16 %v923_v43, %v922_v44  ;;  %v870_v49 = vadd.f32 %v1746_v24, %v869_v47 }
 0x2a2   : > { %v925_v50 = vmax.f32 %v875_v46, 0.0 }
 0x2a3   : > { %944 = vst [vmem:[#allocation4 + $0x10] sm:$0xff] %v936_v48  ;;  %v924_v51 = vmax.f32 %v870_v49, 0.0  ;;  %v1953_v52 = vpop.f32.mrb[8].mxu1 }
 0x2a4   : > { %v885_v53 = vadd.f32 %v1953_v52, %v1746_v24  ;;  %v879_v54 = vpop.f32.mrb[9].mxu1 }
 0x2a5   : > { %v937_v55 = vpack.c.bf16 %v925_v50, %v924_v51  ;;  %v880_v56 = vadd.f32 %v1746_v24, %v879_v54 }
 0x2a6   : > { %v927_v57 = vmax.f32 %v885_v53, 0.0 }
 0x2a7   : > { %945 = vst [vmem:[#allocation4 + $0x18] sm:$0xff] %v937_v55  ;;  %v926_v58 = vmax.f32 %v880_v56, 0.0  ;;  %v1956_v59 = vpop.f32.mrb[10].mxu1 }
 0x2a8   : > { %v895_v60 = vadd.f32 %v1956_v59, %v1746_v24  ;;  %v889_v61 = vpop.f32.mrb[11].mxu1 }
 0x2a9   : > { %v938_v62 = vpack.c.bf16 %v927_v57, %v926_v58  ;;  %v890_v63 = vadd.f32 %v1746_v24, %v889_v61 }
 0x2aa   : > { %v929_v16 = vmax.f32 %v895_v60, 0.0 }
 0x2ab   : > { %946 = vst [vmem:[#allocation4 + $0x20] sm:$0xff] %v938_v62  ;;  %v928_v17 = vmax.f32 %v890_v63, 0.0  ;;  %v1959_v18 = vpop.f32.mrb[12].mxu1 }
 0x2ac   : > { %v905_v19 = vadd.f32 %v1959_v18, %v1746_v24  ;;  %v899_v20 = vpop.f32.mrb[13].mxu1 }
 0x2ad   : > { %v939_v21 = vpack.c.bf16 %v929_v16, %v928_v17  ;;  %v900_v22 = vadd.f32 %v1746_v24, %v899_v20 }
 0x2ae   : > { %v931_v23 = vmax.f32 %v905_v19, 0.0 }
 0x2af   : > { %947 = vst [vmem:[#allocation4 + $0x28] sm:$0xff] %v939_v21  ;;  %v930_v25 = vmax.f32 %v900_v22, 0.0  ;;  %v1962_v26 = vpop.f32.mrb[14].mxu1 }
 0x2b0   : > { %v915_v27 = vadd.f32 %v1962_v26, %v1746_v24  ;;  %v909_v28 = vpop.f32.mrb[15].mxu1 }
 0x2b1   : > { %v940_v29 = vpack.c.bf16 %v931_v23, %v930_v25  ;;  %v910_v30 = vadd.f32 %v1746_v24, %v909_v28 }
 0x2b2   : > { %v933_v31 = vmax.f32 %v915_v27, 0.0 }
 0x2b3   : > { %948 = vst [vmem:[#allocation4 + $0x30] sm:$0xff] %v940_v29  ;;  %v932_v32 = vmax.f32 %v910_v30, 0.0 }
 0x2b5   : > { %v941_v33 = vpack.c.bf16 %v933_v31, %v932_v32 }
 0x2b7   : > { %949 = vst [vmem:[#allocation4 + $0x38] sm:$0xff] %v941_v33 }
 0x2b8 PF: > { %p1747_p12 = scmp.ne.s32.totalorder %s2545_s30, 1 }
 0x2b9   : > { %v995_v34 = vld [vmem:[#allocation4] sm:$0xff] (!%p1747_p12)  ;;  %v996_v35 = vld [vmem:[#allocation4 + $0x8] sm:$0xff] (!%p1747_p12)  ;;  %v1748_v36 = vcombine.low (!%p1747_p12), %v2919_v0, %v2921_v1  ;;  %v1201_v38 = vld [vmem:[#allocation11 + $0x10] sm:$0xff] (!%p1747_p12)  ;;  %v1749_v61 = vcombine.low (!%p1747_p12), %v2923_v2, %v2925_v3  ;;  %v1750_v17 = vcombine.low (!%p1747_p12), %v2927_v4, %v2929_v5  ;;  %v1751_v18 = vcombine.low (!%p1747_p12), %v2931_v6, %v2933_v7  ;;  %s3104_s18 = sld [smem:[#allocation26_spill]] (!%p1747_p12)  ;;  %s3105_s24 = sld [smem:[#allocation28_spill]] (!%p1747_p12) }
 0x2ba   : > { %953 = sbr.rel (%p1747_p12) target bundleno = 1708 (0x6ac), region = 88  ;;  %1963 = vmatprep.subr.bf16.mxu0 (!%p1747_p12), %v995_v34  ;;  %v1199_v37 = vld [vmem:[#allocation11] sm:$0xff] (!%p1747_p12)  ;;  %v1200_v24 = vld [vmem:[#allocation11 + $0x8] sm:$0xff] (!%p1747_p12)  ;;  %v1202_v39 = vld [vmem:[#allocation11 + $0x18] sm:$0xff] (!%p1747_p12)  ;;  %v1752_v21 = vcombine.low (!%p1747_p12), %v2935_v8, %v2937_v9  ;;  %v2572_v2 = vmov (!%p1747_p12), 0.0|0.0   ;;  %v1753_v6 = vcombine.low (!%p1747_p12), %v2939_v10, %v2941_v11  ;;  %v1754_v10 = vcombine.low (!%p1747_p12), %v2943_v12, %v2945_v13 }
 0x2bb   : > { %1964 = vmatpush3.bf16.msra.mxu0 (!%p1747_p12), %v995_v34  ;;  %1979 = vmatprep.mubr.bf16.mxu0 (!%p1747_p12), %v1748_v36  ;;  %v997_v40 = vld [vmem:[#allocation4 + $0x10] sm:$0xff] (!%p1747_p12)  ;;  %v2118_v41 = vpack.c.bf16 (!%p1747_p12), %v1200_v24, %v1199_v37  ;;  %v2122_v42 = vpack.c.bf16 (!%p1747_p12), %v1202_v39, %v1201_v38  ;;  %v1203_v43 = vld [vmem:[#allocation11 + $0x20] sm:$0xff] (!%p1747_p12)  ;;  %v1204_v44 = vld [vmem:[#allocation11 + $0x28] sm:$0xff] (!%p1747_p12)  ;;  %v1755_v11 = vcombine.low (!%p1747_p12), %v2947_v14, %v2949_v15  ;;  %vm2573_vm0 = vmmov (!%p1747_p12), 0  }
 0x2bc   : > { %1965 = vmatprep.subr.bf16.mxu0 (!%p1747_p12), %v996_v35  ;;  %v998_v45 = vld [vmem:[#allocation4 + $0x18] sm:$0xff] (!%p1747_p12)  ;;  %v2126_v0 = vpack.c.bf16 (!%p1747_p12), %v1204_v44, %v1203_v43  ;;  %v1205_v1 = vld [vmem:[#allocation11 + $0x30] sm:$0xff] (!%p1747_p12)  ;;  %v999_v47 = vld [vmem:[#allocation4 + $0x20] sm:$0xff] (!%p1747_p12)  ;;  %v2574_v15 = vmov (!%p1747_p12), 0.0   ;;  %vm1545_vm2 = vcmask (!%p1747_p12), 1040384  }
 0x2bd   : > { %2119 = vmatprep.subr.bf16.mxu1 (!%p1747_p12), %v2118_v41  ;;  %v1206_v46 = vld [vmem:[#allocation11 + $0x38] sm:$0xff] (!%p1747_p12)  ;;  %v1207_v49 = vld [vmem:[#allocation11 + $0x40] sm:$0xff] (!%p1747_p12)  ;;  %v1208_v50 = vld [vmem:[#allocation11 + $0x48] sm:$0xff] (!%p1747_p12) }
 0x2be   : > { %2121 = vmatpush3.bf16.msra.mxu1 (!%p1747_p12), %v2118_v41  ;;  %v2130_v48 = vpack.c.bf16 (!%p1747_p12), %v1206_v46, %v1205_v1  ;;  %v1000_v51 = vld [vmem:[#allocation4 + $0x28] sm:$0xff] (!%p1747_p12)  ;;  %v2134_v52 = vpack.c.bf16 (!%p1747_p12), %v1208_v50, %v1207_v49  ;;  %v1209_v53 = vld [vmem:[#allocation11 + $0x50] sm:$0xff] (!%p1747_p12)  ;;  %v1210_v54 = vld [vmem:[#allocation11 + $0x58] sm:$0xff] (!%p1747_p12) }
 0x2bf   : > { %1966 = vmatpush3.bf16.msra.mxu0 (!%p1747_p12), %v996_v35  ;;  %2123 = vmatprep.subr.bf16.mxu1 (!%p1747_p12), %v2122_v42  ;;  %v1001_v55 = vld [vmem:[#allocation4 + $0x30] sm:$0xff] (!%p1747_p12)  ;;  %v2138_v56 = vpack.c.bf16 (!%p1747_p12), %v1210_v54, %v1209_v53  ;;  %v1211_v57 = vld [vmem:[#allocation11 + $0x60] sm:$0xff] (!%p1747_p12)  ;;  %v1212_v58 = vld [vmem:[#allocation11 + $0x68] sm:$0xff] (!%p1747_p12) }
 0x2c0   : > { %1967 = vmatprep.subr.bf16.mxu0 (!%p1747_p12), %v997_v40  ;;  %v1002_v59 = vld [vmem:[#allocation4 + $0x38] sm:$0xff] (!%p1747_p12)  ;;  %v2142_v60 = vpack.c.bf16 (!%p1747_p12), %v1212_v58, %v1211_v57  ;;  %v1213_v62 = vld [vmem:[#allocation11 + $0x70] sm:$0xff] (!%p1747_p12)  ;;  %v1454_v19 = vld [vmem:[#allocation13] sm:$0xff] (!%p1747_p12) }
 0x2c1   : > { %v1214_v63 = vld [vmem:[#allocation11 + $0x78] sm:$0xff]  ;;  %v1455_v20 = vld [vmem:[#allocation13 + $0x8] sm:$0xff]  ;;  %v1456_v22 = vld [vmem:[#allocation13 + $0x10] sm:$0xff] }
 0x2c2   : > { %2125 = vmatpush3.bf16.msra.mxu1 %v2122_v42  ;;  %v2146_v16 = vpack.c.bf16 %v1214_v63, %v1213_v62  ;;  %v2151_v3 = vpack.c.bf16 %v1455_v20, %v1454_v19  ;;  %v1457_v23 = vld [vmem:[#allocation13 + $0x18] sm:$0xff]  ;;  %v1458_v4 = vld [vmem:[#allocation13 + $0x20] sm:$0xff]  ;;  %v1459_v5 = vld [vmem:[#allocation13 + $0x28] sm:$0xff] }
 0x2c3   : > { %1968 = vmatpush3.bf16.msra.mxu0 %v997_v40  ;;  %2127 = vmatprep.subr.bf16.mxu1 %v2126_v0  ;;  %v2154_v25 = vpack.c.bf16 %v1457_v23, %v1456_v22  ;;  %v2157_v7 = vpack.c.bf16 %v1459_v5, %v1458_v4  ;;  %v1460_v28 = vld [vmem:[#allocation13 + $0x30] sm:$0xff]  ;;  %v1461_v29 = vld [vmem:[#allocation13 + $0x38] sm:$0xff]  ;;  %v1462_v31 = vld [vmem:[#allocation13 + $0x40] sm:$0xff] }
 0x2c4   : > { %1969 = vmatprep.subr.bf16.mxu0 %v998_v45  ;;  %v2160_v30 = vpack.c.bf16 %v1461_v29, %v1460_v28  ;;  %v1463_v32 = vld [vmem:[#allocation13 + $0x48] sm:$0xff]  ;;  %v1464_v34 = vld [vmem:[#allocation13 + $0x50] sm:$0xff]  ;;  %v1465_v35 = vld [vmem:[#allocation13 + $0x58] sm:$0xff] }
 0x2c5   : > { %v2163_v33 = vpack.c.bf16 %v1463_v32, %v1462_v31  ;;  %v2166_v36 = vpack.c.bf16 %v1465_v35, %v1464_v34  ;;  %v1466_v37 = vld [vmem:[#allocation13 + $0x60] sm:$0xff]  ;;  %v1467_v24 = vld [vmem:[#allocation13 + $0x68] sm:$0xff]  ;;  %v1468_v12 = vld [vmem:[#allocation13 + $0x70] sm:$0xff] }
 0x2c6   : > { %2129 = vmatpush3.bf16.msra.mxu1 %v2126_v0  ;;  %v2169_v38 = vpack.c.bf16 %v1467_v24, %v1466_v37  ;;  %v1469_v13 = vld [vmem:[#allocation13 + $0x78] sm:$0xff]  ;;  %v1756_v1 = vld [vmem:[%s3104_s18] ss:$0 sm:$0xff] }
 0x2c7   : > { %1970 = vmatpush3.bf16.msra.mxu0 %v998_v45  ;;  %2131 = vmatprep.subr.bf16.mxu1 %v2130_v48  ;;  %v2172_v14 = vpack.c.bf16 %v1469_v13, %v1468_v12  ;;  %v1470_v23 = vld [vmem:[%s3105_s24] sm:$0x1] }
 0x2c8   : > { %1971 = vmatprep.subr.bf16.mxu0 %v999_v47 }
 0x2ca   : > { %2133 = vmatpush3.bf16.msra.mxu1 %v2130_v48 }
 0x2cb   : > { %1972 = vmatpush3.bf16.msra.mxu0 %v999_v47  ;;  %2135 = vmatprep.subr.bf16.mxu1 %v2134_v52 }
 0x2cc   : > { %1973 = vmatprep.subr.bf16.mxu0 %v1000_v51 }
 0x2ce   : > { %2137 = vmatpush3.bf16.msra.mxu1 %v2134_v52 }
 0x2cf   : > { %1974 = vmatpush3.bf16.msra.mxu0 %v1000_v51  ;;  %2139 = vmatprep.subr.bf16.mxu1 %v2138_v56 }
 0x2d0   : > { %1975 = vmatprep.subr.bf16.mxu0 %v1001_v55 }
 0x2d2   : > { %2141 = vmatpush3.bf16.msra.mxu1 %v2138_v56 }
 0x2d3   : > { %1976 = vmatpush3.bf16.msra.mxu0 %v1001_v55  ;;  %2143 = vmatprep.subr.bf16.mxu1 %v2142_v60 }
 0x2d4   : > { %1977 = vmatprep.subr.bf16.mxu0 %v1002_v59 }
 0x2d6   : > { %2145 = vmatpush3.bf16.msra.mxu1 %v2142_v60 }
 0x2d7   : > { %1978 = vmatpush3.bf16.msra.mxu0 %v1002_v59  ;;  %2147 = vmatprep.subr.bf16.mxu1 %v2146_v16 }
 0x2d8   : > { %2150 = vmatprep.subr.bf16.mxu0 %v2572_v2 }
 0x2da   : > { %1980 = vmatmul.mubr.bf16.vlgmr.msra.gmra.mrb[0].mxu0 %v1749_v61  ;;  %2149 = vmatpush3.bf16.msra.mxu1 %v2146_v16 }
 0x2db   : > { %1983 = vmatprep.mubr.bf16.mxu0 %v1750_v17  ;;  %2152 = vmatpush3.bf16.msra.mxu0 %v2151_v3  ;;  %v1541_v3 = vlaneseq }
 0x2dc   : > { %2153 = vmatprep.subr.bf16.mxu0 %v2572_v2 }
 0x2dd   : > { %v1542_v22 = vand.u32 127, %v1541_v3 }
 0x2df   : > { %2155 = vmatpush3.bf16.msra.mxu0 %v2154_v25  ;;  %vm1543_vm1 = vcmp.lt.s32.totalorder %v1542_v22, 2 }
 0x2e0   : > { %2156 = vmatprep.subr.bf16.mxu0 %v2572_v2 }
 0x2e2   : > { %1984 = vmatmul.mubr.bf16.gmra.mrb[4].mxu0 %v1751_v18 }
 0x2e3   : > { %1987 = vmatprep.mubr.bf16.mxu0 %v1752_v21  ;;  %2158 = vmatpush3.bf16.msra.mxu0 %v2157_v7 }
 0x2e4   : > { %2159 = vmatprep.subr.bf16.mxu0 %v2572_v2 }
 0x2e7   : > { %2161 = vmatpush3.bf16.msra.mxu0 %v2160_v30 }
 0x2e8   : > { %2162 = vmatprep.subr.bf16.mxu0 %v2572_v2 }
 0x2ea   : > { %1988 = vmatmul.mubr.bf16.gmra.mrb[8].mxu0 %v1753_v6 }
 0x2eb   : > { %1991 = vmatprep.mubr.bf16.mxu0 %v1754_v10  ;;  %2164 = vmatpush3.bf16.msra.mxu0 %v2163_v33 }
 0x2ec   : > { %2165 = vmatprep.subr.bf16.mxu0 %v2572_v2 }
 0x2ef   : > { %2167 = vmatpush3.bf16.msra.mxu0 %v2166_v36 }
 0x2f0   : > { %2168 = vmatprep.subr.bf16.mxu0 %v2572_v2 }
 0x2f2   : > { %1992 = vmatmul.mubr.bf16.gmra.mrb[12].mxu0 %v1755_v11 }
 0x2f3   : > { %2170 = vmatpush3.bf16.msra.mxu0 %v2169_v38  ;;  %2083 = vmatprep.mubr.msk.f32.mxu0 %vm2573_vm0, %v2574_v15 }
 0x2f4   : > { %2171 = vmatprep.subr.bf16.mxu0 %v2572_v2 }
 0x2f7   : > { %2173 = vmatpush3.bf16.msra.mxu0 %v2172_v14 }
 0x3ad   : > { %v1981_v8 = vpop.f32.mrb[0].mxu0 }
 0x3ae   : > { %v1085_v9 = vpop.f32.mrb[1].mxu0 }
 0x3af   : > { %v1982_v26 = vpop.f32.mrb[2].mxu0  ;;  %2027 = vmatprep.mubr.f32.mxu1 %v1085_v9 }
 0x3b0   : > { %v1088_v27 = vpop.f32.mrb[3].mxu0 }
 0x3b1   : > { %2028 = vmatmul.mubr.f32.vlgmr.msra.gmra.mrb[0].mxu1 %v1088_v27 }
 0x3b2   : > { %2030 = vmatprep.mubr.f32.mxu1 %v1981_v8 }
 0x3b5   : > { %2031 = vmatmul.mubr.f32.gmra.mrb[2].mxu1 %v1982_v26  ;;  %v1985_v39 = vpop.f32.mrb[4].mxu0 }
 0x3b6   : > { %v1101_v40 = vpop.f32.mrb[5].mxu0 }
 0x3b7   : > { %v1986_v41 = vpop.f32.mrb[6].mxu0  ;;  %2033 = vmatprep.mubr.f32.mxu1 %v1101_v40 }
 0x3b8   : > { %v1104_v42 = vpop.f32.mrb[7].mxu0 }
 0x3b9   : > { %2034 = vmatmul.mubr.f32.gmra.mrb[4].mxu1 %v1104_v42 }
 0x3ba   : > { %2036 = vmatprep.mubr.f32.mxu1 %v1985_v39 }
 0x3bd   : > { %v1989_v43 = vpop.f32.mrb[8].mxu0  ;;  %2037 = vmatmul.mubr.f32.gmra.mrb[6].mxu1 %v1986_v41 }
 0x3be   : > { %v1117_v44 = vpop.f32.mrb[9].mxu0 }
 0x3bf   : > { %v1990_v45 = vpop.f32.mrb[10].mxu0  ;;  %2039 = vmatprep.mubr.f32.mxu1 %v1117_v44 }
 0x3c0   : > { %v1120_v0 = vpop.f32.mrb[11].mxu0 }
 0x3c1   : > { %2040 = vmatmul.mubr.f32.gmra.mrb[8].mxu1 %v1120_v0 }
 0x3c2   : > { %2042 = vmatprep.mubr.f32.mxu1 %v1989_v43 }
 0x3c5   : > { %2043 = vmatmul.mubr.f32.gmra.mrb[10].mxu1 %v1990_v45  ;;  %v1993_v59 = vpop.f32.mrb[12].mxu0 }
 0x3c6   : > { %v1133_v60 = vpop.f32.mrb[13].mxu0 }
 0x3c7   : > { %v1994_v61 = vpop.f32.mrb[14].mxu0  ;;  %2045 = vmatprep.mubr.f32.mxu1 %v1133_v60 }
 0x3c8   : > { %v1136_v62 = vpop.f32.mrb[15].mxu0 }
 0x3c9   : > { %2046 = vmatmul.mubr.f32.gmra.mrb[12].mxu1 %v1136_v62 }
 0x3ca   : > { %2048 = vmatprep.mubr.f32.mxu1 %v1993_v59 }
 0x3cd   : > { %2049 = vmatmul.mubr.f32.gmra.mrb[14].mxu1 %v1994_v61 }
 0x484   : > { %v2029_v46 = vpop.f32.mrb[0].mxu1 }
 0x485   : > { %v1288_v47 = vpop.f32.mrb[1].mxu1 }
 0x486   : > { %v1289_v48 = vadd.f32 %v1756_v1, %v1288_v47 }
 0x488   : > { %v1367_v49 = vmax.f32 %v1289_v48, 0.0  ;;  %v2032_v50 = vpop.f32.mrb[2].mxu1 }
 0x489   : > { %v1298_v51 = vpop.f32.mrb[3].mxu1 }
 0x48a   : > { %v1447_v52 = vrot.slane %v1367_v49, 4 }
 0x48c   : > { %v1448_v53 = vadd.f32 %v1447_v52, %v1367_v49  ;;  %v2035_v63 = vpop.f32.mrb[4].mxu1 }
 0x48d   : > { %v1308_v16 = vpop.f32.mrb[5].mxu1 }
 0x48e   : > { %v1449_v54 = vrot.slane %v1448_v53, 2 }
 0x490   : > { %v1450_v55 = vadd.f32 %v1449_v54, %v1448_v53  ;;  %v2038_v17 = vpop.f32.mrb[6].mxu1 }
 0x491   : > { %v1318_v18 = vpop.f32.mrb[7].mxu1 }
 0x492   : > { %v1451_v56 = vrot.slane %v1450_v55, 1 }
 0x494   : > { %v1452_v57 = vadd.f32 %v1451_v56, %v1450_v55  ;;  %v2041_v19 = vpop.f32.mrb[8].mxu1 }
 0x495   : > { %v1328_v20 = vpop.f32.mrb[9].mxu1 }
 0x496   : > { %v1453_v58 = vmul.f32 0.125, %v1452_v57 }
 0x498   : > { %2084 = vmatmul.mubr.f32.vlgmr.msra.gmra.mrb[16].mxu0 %v1453_v58  ;;  %v2044_v21 = vpop.f32.mrb[10].mxu1 }
 0x499   : > { %v1338_v2 = vpop.f32.mrb[11].mxu1 }
 0x49c   : > { %v2047_v8 = vpop.f32.mrb[12].mxu1 }
 0x49d   : > { %v1348_v9 = vpop.f32.mrb[13].mxu1 }
 0x4a0   : > { %v2050_v26 = vpop.f32.mrb[14].mxu1 }
 0x4a1   : > { %v1358_v27 = vpop.f32.mrb[15].mxu1 }
 0x56b   : > { %v1537_v25 = vpop.f32.mrb[16].mxu0 }
 0x56c   : > { %v1538_v4 = vadd.f32 %v1537_v25, %v1470_v23  ;;  %v2085_v5 = vpop.f32.mrb[17].mxu0 }
 0x56e   : > { %v1544_v6 = vsel %vm1543_vm1, %v1538_v4, -1e+30 }
 0x56f   : > { %v1546_v7 = vsel %vm1545_vm2, %v1544_v6, -inf }
 0x570   : > { %1547 = vmax.xlane.f32.xlu0 %v1546_v7 }
 0x5fd   : > { %v1548_v28 = vpop.xlane.xlu0 %1547 }
 0x5fe   : > { %v1549_v29 = vsub.f32 %v1544_v6, %v1548_v28 }
 0x600   : > { %v1550_v30 = vmul.f32 1.442695, %v1549_v29 }
 0x602   : > { %2303 = vpow2.f32 %v1550_v30 }
 0x60c   : > { %v2304_v10 = vpop.eup %2303 }
 0x60d   : > { %v1552_v11 = vsel %vm1545_vm2, %v2304_v10, 0.0 }
 0x60e   : > { %1553 = vadd.xlane.f32.xlu0 %v1552_v11 }
 0x69b   : > { %v1554_v31 = vpop.xlane.xlu0 %1553 }
 0x69c   : > { %2305 = vlog2.f32 %v1554_v31 }
 0x6a6   : > { %v2306_v32 = vpop.eup %2305 }
 0x6a7   : > { %v1556_v33 = vmul.f32 0.6931472, %v2306_v32 }
 0x6a9   : > { %v1557_v34 = vsub.f32 %v1549_v29, %v1556_v33 }
 0x6ab   : > { %1558 = vst [vmem:[%s431_s13] sm:$0x1] %v1557_v34 }
 0x6ac PF: > { %s3106_s2 = sld [smem:[#allocation21_spill]]  ;;  %s3107_s21 = sld [smem:[#allocation29_spill]] }
 0x6ad   : > { %s1572_s5 = sshll.u32 %s431_s13, 4  ;;  %s1560_s0 = scalar_lea.sflag [#allocation7], %s2896_s6  ;;  %s1573_s5 = int_to_ptr.vmem [resolvable:$true] %s1572_s5 }
 0x6ae   : > { %s2451_s4 = scalar_lea.vmem %s1573_s5, 16  ;;  %s2575_s17 = smov [#allocation14]  }
 0x6af   : > { %p2452_p2 = scmp.ne.s32.totalorder %s1573_s5, %s2451_s4  ;;  %s2455_s15 = sshll.u32 %s2575_s17, 4  ;;  %s2456_s15 = int_to_ptr.vmem [resolvable:$false] %s2455_s15 }
 0x6b0   : > { %s2457_s22 = scalar_lea.vmem %s2456_s15, 32  ;;  %p2458_p5 = scmp.lt.s32.totalorder %s1573_s5, %s2456_s15 }
 0x6b1   : > { %p2453_p6 = pnand %p2452_p2, %p2790_p0  ;;  %p2459_p7 = scmp.lt.s32.totalorder %s2457_s22, %s2451_s4 }
 0x6b2   : > { %s1757_s25 = sshll.u32 %s3106_s2, 4 }
 0x6b3   : > { %s3009_s16 = scalar_lea.hbm %s3107_s21, %s1757_s25  ;;  %p2454_p3 = pneg %p2453_p6 }
 0x6b4   : > { %p2460_p13 = por %p2459_p7, %p2458_p5 }
 0x6b6   : > { %p2461_p10 = pnand %p2460_p13, %p2454_p3 }
 0x6b8   : > { %2464 = shalt.err (!%p2461_p10)
}
 0x6b9   : > { %s2465_s6 = scalar_lea.hbm %s3009_s16, 16  ;;  %s2469_s26 = scalar_lea.hbm %s3107_s21, 32 }
 0x6ba   : > { %p2466_p9 = scmp.ne.s32.totalorder %s3009_s16, %s2465_s6  ;;  %p2470_p4 = scmp.lt.u32.totalorder %s3009_s16, %s3107_s21 }
 0x6bb   : > { %p2471_p8 = scmp.lt.u32.totalorder %s2469_s26, %s2465_s6  ;;  %p2473_p2 = scmp.lt.u32.totalorder %s2465_s6, %s3009_s16 }
 0x6bc   : > { %p2467_p11 = pnand %p2466_p9, %p2790_p0 }
 0x6bd   : > { %p2472_p12 = por %p2471_p8, %p2470_p4 }
 0x6be   : > { %p2468_p1 = pneg %p2467_p11 }
 0x6bf   : > { %p2474_p6 = por %p2473_p2, %p2472_p12 }
 0x6c1   : > { %p2475_p3 = pnand %p2474_p6, %p2468_p1 }
 0x6c3   : > { %2478 = shalt.err (!%p2475_p3)
}
 0x6c4   : > { %2190 = dma.vmem_to_hbm [thread:$0]  (%p2790_p0), %s1573_s5, 16, %s3009_s16, %s1560_s0  }
 0x6c5 PF: > { %s3108_s23 = sld [smem:[#allocation20_spill]]  ;;  %s3109_s24 = sld [smem:[#allocation22_spill]] }
 0x6c6   : > { %p2220_p5 = scmp.ge.s32.totalorder %s2561_s12, 2 }
 0x6cb   : > { %s1584_s2 = sand.u32 1, %s3108_s23   ;;  %p3110_p7 = scmp.ne.s32.totalorder %s3109_s24, 0 }
 0x6cc   : > { %s1585_s25 = scalar_lea.sflag [#allocation7], %s1584_s2 }
 0x6cd   : > { %p2210_p13 = pnand %p2220_p5, %p3110_p7 }
 0x6cf   : > { %2528 = dma.done.wait (!%p2210_p13), %s1585_s25, 16  }
 0x6d0   : > { %2530 = vsyncadd (!%p2210_p13), %s1585_s25, 4294967280  ;;  %s28_s12 = sadd.s32 1, %s2561_s12   ;;  %s3111_s8 = smov %s3120_s27 }
 0x6d1   : > { %p25_p10 = scmp.ge.s32.totalorder %s28_s12, 6   ;;  %s3112_s27 = smov %s2537_s28 }
 0x6d2   : > { %s3113_s28 = smov %s2541_s29  ;;  %s3114_s29 = smov %s2812_s19 }
 0x6d3   : > { %s3115_s30 = smov %s2553_s10  ;;  %s3116_s9 = smov %s2557_s11 }
 0x6d4   : > { %s3117_s10 = smov %s3111_s8  ;;  %s3118_s11 = smov %s3124_s20 }
 0x6d5   :  { %27 = sbr.rel (!%p25_p10) target bundleno = 18 (0x12), region = 147 }
 0x6dc   :  { %1589 = vsyncpa [#allocation6], 1 }
 0x6dd   :  { %1591 = vsyncpa [#allocation6 + $0x1], 1 }
 0x6de   :  { %1592 = vsyncpa [#allocation9], 1 }
 0x6df   :  { %1594 = vsyncpa [#allocation9 + $0x1], 1 }
 0x6e0   :  { %1595 = vsyncpa [#allocation12], 1 }
 0x6e1   :  { %1596 = vsyncpa [#allocation7], 1 }
 0x6e2   :  { %1598 = vsyncpa [#allocation7 + $0x1], 1 }

</bundles_post_ra>
